<compile_context>
chip_gen: v6e
topology: v6e:2x2x1
jax: 0.10.0
libtpu: 0.0.40
codegen_flags: <defaults>
</compile_context>

<pallas_src>
from functools import partial

import jax
import jax.numpy as jnp
from jax.experimental import pallas as pl
from jax.experimental.pallas import tpu as pltpu


def _patch_proj_kernel(p_ref, w_ref, b_ref, o_ref):
    # p_ref: (TM, K) bf16   w_ref: (K, TE) bf16   b_ref: (1, TE) f32   o_ref: (TM, TE) bf16
    acc = jnp.dot(p_ref[...], w_ref[...], preferred_element_type=jnp.float32)
    o_ref[...] = (acc + b_ref[...]).astype(o_ref.dtype)   # f32 epilogue, bf16 store


def _round_up(x, m):
    return -(-x // m) * m


@partial(jax.jit, static_argnums=(3,))
def patch_embeddings_forward(x, conv_w, conv_b, patch_size):
    """x: (B, C, H, W) f32 NCHW. conv_w: (E, C, P, P). conv_b: (E,).
    Returns (B, N, E) bf16, N = (H//P)*(W//P)."""
    B, C, H, W = x.shape
    P = patch_size
    E = conv_w.shape[0]
    assert H % P == 0 and W % P == 0, "image size must be divisible by patch size"
    nH, nW = H // P, W // P
    N = nH * nW
    K = C * P * P
    M = B * N

    # ---- im2col (bf16 first so any materialized copy is half-width) ----
    # Inner order (C, kh, kw) matches the flattened Conv2d weight.
    xb = x.astype(jnp.bfloat16)
    patches = (xb.reshape(B, C, nH, P, nW, P)
                 .transpose(0, 2, 4, 1, 3, 5)
                 .reshape(M, K))

    # ---- fixed M tiles + padding (no full-M fallback, no tiny-tile fallback) ----
    if M >= 1024:
        tile_m = 512
    elif M >= 512:
        tile_m = 256                     # still >=2 M tiles for v7x dual TC
    else:
        tile_m = _round_up(M, 8)         # small problem: one sublane-aligned tile
    M_pad = _round_up(M, tile_m)
    if M_pad != M:
        patches = jnp.pad(patches, ((0, M_pad - M), (0, 0)))

    # ---- E padding (lane-dense output stores) + resident-weight decision ----
    E_pad = _round_up(E, 128)
    weight_budget_bytes = 8 * 1024 * 1024          # bf16 resident-weight budget
    if K * E_pad * 2 <= weight_budget_bytes:
        tile_e = E_pad                             # weight fully VMEM-resident
    else:
        E_pad = _round_up(E, 256)
        tile_e = 256                               # rare fallback: 256-wide E tiles
    ne = E_pad // tile_e
    nm = M_pad // tile_m

    w_mat = conv_w.reshape(E, K).T.astype(jnp.bfloat16)     # (K, E)
    b_mat = conv_b.reshape(1, E).astype(jnp.float32)        # (1, E)
    if E_pad != E:
        w_mat = jnp.pad(w_mat, ((0, 0), (0, E_pad - E)))
        b_mat = jnp.pad(b_mat, ((0, 0), (0, E_pad - E)))

    # Bytes the pallas_call itself moves: patches streamed once per E tile,
    # weight/bias fetched once, bf16 output writeback.
    cost = pl.CostEstimate(
        flops=2 * M_pad * K * E_pad,
        transcendentals=0,
        bytes_accessed=(ne * M_pad * K * 2 + K * E_pad * 2
                        + E_pad * 4 + M_pad * E_pad * 2),
    )

    if ne == 1:
        # 1-D grid over M tiles; weight + bias resident across the whole grid.
        grid = (nm,)
        in_specs = [
            pl.BlockSpec((tile_m, K), lambda i: (i, 0)),      # streamed patches
            pl.BlockSpec((K, E_pad), lambda i: (0, 0)),       # resident weight
            pl.BlockSpec((1, E_pad), lambda i: (0, 0)),       # resident bias
        ]
        out_spec = pl.BlockSpec((tile_m, E_pad), lambda i: (i, 0))
        dim_sem = ("parallel",)
    else:
        # E outermost: each weight tile is fetched once; patches re-streamed
        # per E tile (weight is tiny next to patches in this regime anyway).
        grid = (ne, nm)
        in_specs = [
            pl.BlockSpec((tile_m, K), lambda j, i: (i, 0)),
            pl.BlockSpec((K, tile_e), lambda j, i: (0, j)),
            pl.BlockSpec((1, tile_e), lambda j, i: (0, j)),
        ]
        out_spec = pl.BlockSpec((tile_m, tile_e), lambda j, i: (i, j))
        dim_sem = ("parallel", "parallel")

    out = pl.pallas_call(
        _patch_proj_kernel,
        out_shape=jax.ShapeDtypeStruct((M_pad, E_pad), jnp.bfloat16),
        grid_spec=pltpu.PrefetchScalarGridSpec(
            num_scalar_prefetch=0,
            grid=grid,
            in_specs=in_specs,
            out_specs=out_spec,
        ),
        compiler_params=pltpu.CompilerParams(
            dimension_semantics=dim_sem,
            allow_input_fusion=[True, False, False],   # fuse im2col into input DMA
        ),
        cost_estimate=cost,
    )(patches, w_mat, b_mat)

    out = out[:M, :E]                    # drop padded rows / cols
    return out.reshape(B, N, E)          # contiguous reshape, metadata only


def reference_forward(x, conv_w, conv_b, patch_size):
    """Plain-JAX f32 reference mirroring the PyTorch module."""
    B, C, H, W = x.shape
    P = patch_size
    E = conv_w.shape[0]
    nH, nW = H // P, W // P
    N = nH * nW
    patches = (x.reshape(B, C, nH, P, nW, P)
                 .transpose(0, 2, 4, 1, 3, 5)
                 .reshape(B, N, C * P * P))
    return patches @ conv_w.reshape(E, -1).T + conv_b[None, None, :]


if __name__ == "__main__":
    # Small shapes consistent with the module.
    image_size, patch_size, num_channels, emb_dim = 16, 4, 4, 32
    batch = 2
    num_patches = (image_size // patch_size) ** 2   # 16

    key = jax.random.PRNGKey(0)
    k_x, k_w, k_b = jax.random.split(key, 3)

    x = jax.random.normal(k_x, (batch, num_channels, image_size, image_size), jnp.float32)
    conv_w = jax.random.normal(
        k_w, (emb_dim, num_channels, patch_size, patch_size), jnp.float32) * 0.02
    conv_b = jax.random.normal(k_b, (emb_dim,), jnp.float32) * 0.02

    out = patch_embeddings_forward(x, conv_w, conv_b, patch_size)
    out = jax.block_until_ready(out)

    ref = reference_forward(x, conv_w, conv_b, patch_size)
    assert out.shape == (batch, num_patches, emb_dim), out.shape
    out_f32 = out.astype(jnp.float32)
    max_err = float(jnp.max(jnp.abs(out_f32 - ref)))
    # bf16 operands + bf16 output vs f32 reference -> loose-but-safe tolerance.
    assert jnp.allclose(out_f32, ref, atol=2e-2, rtol=2e-2), max_err

    print("KERNEL_OK")
</pallas_src>

<mosaic_0001>
module attributes {stable_mosaic.version = 11 : i64} {
  func.func @_patch_proj_kernel(%arg0: i32, %arg1: memref<32x64xbf16, #tpu.memory_space<vmem>>, %arg2: memref<64x128xbf16, #tpu.memory_space<vmem>>, %arg3: memref<1x128xf32, #tpu.memory_space<vmem>>, %arg4: memref<32x128xbf16, #tpu.memory_space<vmem>>) attributes {dimension_semantics = [#tpu.dimension_semantics<parallel>], iteration_bounds = array<i64: 1>, scalar_prefetch = 0 : i64, scratch_operands = 0 : i64, tpu.core_type = #tpu.core_type<tc>, window_params = [{transform_indices = @transform_0, window_bounds = array<i64: 32, 64>}, {pipeline_mode = #tpu.pipeline_mode<synchronous>, transform_indices = @transform_1, window_bounds = array<i64: 64, 128>}, {pipeline_mode = #tpu.pipeline_mode<synchronous>, transform_indices = @transform_2, window_bounds = array<i64: 1, 128>}, {transform_indices = @transform_3, window_bounds = array<i64: 32, 128>}]} {
    %c0 = arith.constant 0 : index
    %c0_0 = arith.constant 0 : index
    %0 = vector.load %arg1[%c0, %c0_0] : memref<32x64xbf16, #tpu.memory_space<vmem>>, vector<32x64xbf16>
    %c0_1 = arith.constant 0 : index
    %c0_2 = arith.constant 0 : index
    %1 = vector.load %arg2[%c0_1, %c0_2] : memref<64x128xbf16, #tpu.memory_space<vmem>>, vector<64x128xbf16>
    %cst = arith.constant dense<0.000000e+00> : vector<32x128xf32>
    %2 = tpu.matmul %0, %1, %cst {dimension_numbers = #tpu.dot_dimension_numbers<[1], [0], [0], [1], [0, 0, 1, 1], [], []>} : vector<32x64xbf16>, vector<64x128xbf16>, vector<32x128xf32> -> vector<32x128xf32>
    %c0_3 = arith.constant 0 : index
    %c0_4 = arith.constant 0 : index
    %3 = vector.load %arg3[%c0_3, %c0_4] : memref<1x128xf32, #tpu.memory_space<vmem>>, vector<1x128xf32>
    %4 = vector.broadcast %3 : vector<1x128xf32> to vector<32x128xf32>
    %5 = arith.addf %2, %4 : vector<32x128xf32>
    %6 = arith.truncf %5 : vector<32x128xf32> to vector<32x128xbf16>
    %c0_5 = arith.constant 0 : index
    %c0_6 = arith.constant 0 : index
    %7 = vector.load %arg4[%c0_5, %c0_6] : memref<32x128xbf16, #tpu.memory_space<vmem>>, vector<32x128xbf16>
    tpu.vector_store %arg4[%c0_5, %c0_6], %6 {strides = array<i32>} : memref<32x128xbf16, #tpu.memory_space<vmem>>, vector<32x128xbf16>,
    return
  }
  func.func @transform_0(%arg0: i32) -> (i32, i32) {
    %c0_i32 = arith.constant 0 : i32
    %c0_i32_0 = arith.constant 0 : i32
    return %arg0, %c0_i32 : i32, i32
  }
  func.func @transform_1(%arg0: i32) -> (i32, i32) {
    %c0_i32 = arith.constant 0 : i32
    %c0_i32_0 = arith.constant 0 : i32
    %c0_i32_1 = arith.constant 0 : i32
    return %c0_i32, %c0_i32_0 : i32, i32
  }
  func.func @transform_2(%arg0: i32) -> (i32, i32) {
    %c0_i32 = arith.constant 0 : i32
    %c0_i32_0 = arith.constant 0 : i32
    %c0_i32_1 = arith.constant 0 : i32
    return %c0_i32, %c0_i32_0 : i32, i32
  }
  func.func @transform_3(%arg0: i32) -> (i32, i32) {
    %c0_i32 = arith.constant 0 : i32
    %c0_i32_0 = arith.constant 0 : i32
    return %arg0, %c0_i32 : i32, i32
  }
}

</mosaic_0001>

<bundles_post_ra>
// kernel: patch_embeddings_forward.1
= control target key start
LH: loop header
LB: loop body
LE: loop exit
PB: predicated region body
PF: predicated region fallthrough
CT: control target
= control target key end

     0   :  { %vm69_vm0 = vcmask 523264   ;;  %s285_s0 = inlined_call_operand.vmem [shape: bf16[32,64], index: 0, kind: input, shape index: {}]   ;;  %s286_s1 = inlined_call_operand.vmem [shape: bf16[64,128], index: 1, kind: input, shape index: {}]   ;;  %s287_s2 = inlined_call_operand.vmem [shape: f32[1,128], index: 2, kind: input, shape index: {}]   ;;  %s288_s3 = inlined_call_operand.hbm [shape: bf16[32,128], index: 3, kind: output, shape index: {}]  }
   0x1   :  { %v210_v0 = vld [vmem:[%s286_s1 + $0x18] sm:$0xff]   ;;  %v211_v1 = vld [vmem:[%s286_s1 + $0x10] sm:$0xff]   ;;  %v212_v2 = vld [vmem:[%s286_s1 + $0x8] sm:$0xff]  }
   0x2   :  { %195 = vmatprep.subr.bf16.mxu0 %v210_v0  ;;  %v214_v3 = vld [vmem:[%s285_s0] sm:$0xff]  }
   0x3   :  { %196 = vmatpush3.bf16.msra.mxu0 %v210_v0  ;;  %203 = vmatprep.mubr.msk.bf16.mxu0 %vm69_vm0, %v214_v3 }
   0x4   :  { %197 = vmatprep.subr.bf16.mxu0 %v211_v1 }
   0x5   :  { %8 = vsyncpa [#allocation3], 0  ;;  %v213_v4 = vld [vmem:[%s286_s1] sm:$0xff]   ;;  %v215_v5 = vld [vmem:[%s285_s0 + $0x8] sm:$0xff]   ;;  %s238_s26 = smov [#allocation2]  }
   0x6   :  { %v161_v7 = vld [vmem:[%s287_s2] ss:$0 sm:$0xff]  ;;  %s150_s27 = sshll.u32 %s238_s26, 4  ;;  %s151_s27 = int_to_ptr.vmem [resolvable:$true] %s150_s27 }
   0x7   :  { %198 = vmatpush3.bf16.msra.mxu0 %v211_v1  ;;  %s216_s0 = scalar_lea.vmem %s151_s27, 256  ;;  %p221_p1 = scmp.lt.s32.totalorder %s151_s27, %s151_s27 }
   0x8   :  { %199 = vmatprep.subr.bf16.mxu0 %v212_v2  ;;  %p217_p0 = scmp.ne.s32.totalorder %s151_s27, %s216_s0  ;;  %p222_p2 = scmp.lt.s32.totalorder %s216_s0, %s216_s0 }
   0xa   :  { %p223_p3 = por %p222_p2, %p221_p1 }
   0xb   :  { %200 = vmatpush3.bf16.msra.mxu0 %v212_v2 }
   0xc   :  { %201 = vmatprep.subr.bf16.mxu0 %v213_v4  ;;  %p224_p4 = pnand %p223_p3, %p217_p0 }
   0xf   :  { %202 = vmatpush3.bf16.msra.mxu0 %v213_v4 }
  0x12   :  { %204 = vmatmul.mubr.msk.bf16.vlgmr.msra.gmra.mxu0 %vm69_vm0, %v215_v5 }
  0xd2   :  { %v205_v6 = vpop.f32.mrf.mxu0 }
  0xd3   :  { %v119_v10 = vadd.f32 %v205_v6, %v161_v7 }
  0xd4   :  { %v110_v8 = vpop.f32.mrf.mxu0 }
  0xd5   :  { %v111_v13 = vadd.f32 %v161_v7, %v110_v8 }
  0xd6   :  { %v206_v9 = vpop.f32.mrf.mxu0 }
  0xd7   :  { %v122_v11 = vadd.f32 %v206_v9, %v161_v7 }
  0xd8   :  { %v113_v12 = vpop.f32.mrf.mxu0 }
  0xd9   :  { %v186_v14 = vpack.c.bf16 %v122_v11, %v119_v10  ;;  %v114_v15 = vadd.f32 %v161_v7, %v113_v12 }
  0xdb   :  { %188 = vst [vmem:[#allocation2 + $0x8] sm:$0xff] %v186_v14   ;;  %v181_v16 = vpack.c.bf16 %v114_v15, %v111_v13 }
  0xdd   :  { %182 = vst [vmem:[#allocation2] sm:$0xff] %v181_v16  }
  0xde   :  { %227 = shalt.err (!%p224_p4)
}
  0xdf   :  { %s239_s1 = smov 64   ;;  %s240_s2 = smov 4  }
  0xe0   :  { %156 = dma.vmem_to_hbm [thread:$0]  %s151_s27, 256, %s288_s3, [#allocation3], %s239_s1, %s239_s1, %s240_s2  }
  0xe1   :  { %236 = dma.done.wait [#allocation3], 256  }
  0xe2   :  { %237 = vsyncadd [#allocation3], 4294967040 }
  0xe3   :  { %160 = vsyncpa [#allocation3], 1 }

</bundles_post_ra>
